<compile_context>
chip_gen: v5e
topology: v5e:2x2
jax: 0.10.0
libtpu: 0.0.40
codegen_flags: <defaults>
</compile_context>

<pallas_src>
import functools

import jax
import jax.numpy as jnp
from jax import lax
from jax.experimental import pallas as pl
from jax.experimental.pallas import tpu as pltpu


def _round_up(v, m):
    return (v + m - 1) // m * m


def _vmem_budget_bytes():
    """Generation-aware scoped-VMEM budget (~48 MiB v7x, ~96 MiB v5e/v6e)."""
    cap = 64 << 20  # conservative fallback (v7x physical VMEM)
    try:
        info = pltpu.get_tpu_info()
        cap = int(getattr(info, "vmem_capacity_bytes", cap))
    except Exception:
        pass
    return int(cap * 3 // 4)


def _plan_tiles(n_pad, s_pad, d, kl_pad, in_bytes, budget):
    """Pick (tm, tn) that fit the budget, counting every double-buffered tile."""
    if n_pad >= 128:
        tm_cands = [c for c in (512, 256, 128) if c <= n_pad and n_pad % c == 0]
    else:
        tm_cands = []
    if not tm_cands:
        tm_cands = [n_pad]
    tn_cands = [c for c in (1024, 512, 256, 128) if c <= s_pad and s_pad % c == 0]
    if not tn_cands:
        tn_cands = [s_pad]

    def working_set(tm, tn):
        return (2 * tm * d * in_bytes          # x tile
                + 2 * tm * kl_pad * in_bytes   # qp_n tile
                + 2 * d * tn * in_bytes        # W^T tile
                + 2 * kl_pad * tn * in_bytes   # wp_n^T tile
                + 2 * tn * 4                   # bias row
                + 2 * tm * tn * 4              # logits out (f32)
                + 2 * tm * tn * 2)             # cosine out (bf16)

    ti, tj = 0, 0
    # Shrink tn first (keeps tm large -> fewer HBM re-reads of the W tiles).
    while working_set(tm_cands[ti], tn_cands[tj]) > budget:
        if tj + 1 < len(tn_cands):
            tj += 1
        elif ti + 1 < len(tm_cands):
            ti += 1
        else:
            break
    return tm_cands[ti], tn_cands[tj]


def _fused_kernel(x_ref, wt_ref, brow_ref, qpn_ref, wpt_ref,
                  logits_ref, cos_ref):
    """Per (i, j) tile: sampled logits and SimHash-projected cosine.

    x (TM, D), W^T (D, TN), bias row (1, TN), qp_n (TM, KLp), wp_n^T (KLp, TN)
    -> logits (TM, TN) f32, cos (TM, TN) bf16.  Both dots are plain NN
    matmuls (MXU, f32 accumulate); no transposes, norms or transcendentals.
    """
    logits_ref[...] = (jnp.dot(x_ref[...], wt_ref[...],
                               preferred_element_type=jnp.float32)
                       + brow_ref[...])
    cos = jnp.dot(qpn_ref[...], wpt_ref[...],
                  preferred_element_type=jnp.float32)
    cos_ref[...] = cos.astype(cos_ref.dtype)


def _fused_pallas(x_p, w_t, b_row, qpn, wpt, *, tm, tn, vmem_limit):
    n_pad, d = x_p.shape
    s_pad = w_t.shape[1]
    kl_pad = qpn.shape[1]
    grid = (n_pad // tm, s_pad // tn)
    in_bytes = jnp.dtype(x_p.dtype).itemsize
    n_sweeps = grid[0]  # how many times the W / wp_n / bias tiles are re-read

    flops = 2 * n_pad * s_pad * (d + kl_pad)
    bytes_accessed = (n_pad * d * in_bytes                       # x
                      + n_pad * kl_pad * in_bytes                # qp_n
                      + n_sweeps * s_pad * d * in_bytes          # W^T re-reads
                      + n_sweeps * s_pad * kl_pad * in_bytes     # wp_n^T re-reads
                      + n_sweeps * s_pad * 4                     # bias row
                      + n_pad * s_pad * 4                        # logits out
                      + n_pad * s_pad * 2)                       # cos out (bf16)

    return pl.pallas_call(
        _fused_kernel,
        out_shape=(jax.ShapeDtypeStruct((n_pad, s_pad), jnp.float32),
                   jax.ShapeDtypeStruct((n_pad, s_pad), jnp.bfloat16)),
        grid_spec=pltpu.PrefetchScalarGridSpec(
            num_scalar_prefetch=0,
            grid=grid,
            in_specs=[
                pl.BlockSpec((tm, d), lambda i, j: (i, 0)),        # x (resident over j)
                pl.BlockSpec((d, tn), lambda i, j: (0, j)),        # W^T tile
                pl.BlockSpec((1, tn), lambda i, j: (0, j)),        # bias row
                pl.BlockSpec((tm, kl_pad), lambda i, j: (i, 0)),   # qp_n (resident over j)
                pl.BlockSpec((kl_pad, tn), lambda i, j: (0, j)),   # wp_n^T tile
            ],
            out_specs=[
                pl.BlockSpec((tm, tn), lambda i, j: (i, j)),       # logits
                pl.BlockSpec((tm, tn), lambda i, j: (i, j)),       # cosine
            ],
        ),
        compiler_params=pltpu.CompilerParams(
            # No scratch / accumulator: every (i, j) tile is independent, so
            # both axes shard freely across TensorCores.
            dimension_semantics=("parallel", "parallel"),
            vmem_limit_bytes=int(vmem_limit),
        ),
        cost_estimate=pl.CostEstimate(flops=int(flops),
                                      transcendentals=0,
                                      bytes_accessed=int(bytes_accessed)),
    )(x_p, w_t, b_row, qpn, wpt)


@functools.partial(jax.jit, static_argnames=("num_class", "alpha", "mxu_dtype"))
def lsh_sampled_forward(x, weight, bias, rp, sample_ids, perm_key, *,
                        num_class, alpha=1.0, mxu_dtype=jnp.bfloat16):
    """Forward pass of LSHSampledLayer (eval-mode semantics), fully jitted."""
    f32 = jnp.float32
    eps = 1e-6
    x = x.astype(f32)
    N, D = x.shape
    S = int(sample_ids.shape[0])
    KL = int(rp.shape[1])

    # F.embedding(sample_ids, weight) / bias.squeeze()[sample_ids]
    sample_weights = weight[sample_ids].astype(f32)          # (S, D)
    sample_bias = bias.reshape(-1)[sample_ids].astype(f32)   # (S,)

    # ---- hoisted SimHash projections (depend only on rows / cols) ----------
    rp_main = rp[:D].astype(f32)          # (D, KL)
    rp_last = rp[D].astype(f32)           # (KL,)
    # query_aug = [x, 1]  -> qp = x @ rp[:D] + rp[D]
    qp = x @ rp_main + rp_last[None, :]
    qp_n = qp * lax.rsqrt(jnp.maximum(
        jnp.sum(qp * qp, axis=-1, keepdims=True), eps * eps))
    # weight_aug = [W_s, bias_s] -> wp = W_s @ rp[:D] + bias_s * rp[D]
    wp = sample_weights @ rp_main + sample_bias[:, None] * rp_last[None, :]
    wp_n = wp * lax.rsqrt(jnp.maximum(
        jnp.sum(wp * wp, axis=-1, keepdims=True), eps * eps))

    # ---- lane-dense padding, pre-transposed operands, tile plan ------------
    S_pad = _round_up(max(S, 128), 128)
    KL_pad = _round_up(max(KL, 128), 128)
    N_pad = _round_up(N, 128) if N >= 128 else _round_up(N, 16)

    in_bytes = jnp.dtype(mxu_dtype).itemsize
    budget = _vmem_budget_bytes()
    tm, tn = _plan_tiles(N_pad, S_pad, D, KL_pad, in_bytes, budget)

    x_p = jnp.pad(x, ((0, N_pad - N), (0, 0))).astype(mxu_dtype)
    w_t = jnp.pad(sample_weights.T, ((0, 0), (0, S_pad - S))).astype(mxu_dtype)
    b_row = jnp.pad(sample_bias, (0, S_pad - S)).reshape(1, S_pad)
    qpn_p = jnp.pad(qp_n, ((0, N_pad - N), (0, KL_pad - KL))).astype(mxu_dtype)
    wpt_p = jnp.pad(wp_n.T, ((0, KL_pad - KL), (0, S_pad - S))).astype(mxu_dtype)

    logits_p, cos_p = _fused_pallas(x_p, w_t, b_row, qpn_p, wpt_p,
                                    tm=tm, tn=tn, vmem_limit=budget)
    logits = logits_p[:N, :S]
    cos = cos_p[:N, :S].astype(f32)
    prod = logits - sample_bias[None, :]   # recover x @ W_s.T

    # ---- kthvalue thresholds via one lax.top_k per row ---------------------
    t1, t2 = 0.001, 0.5
    t1_th = int(num_class * (1 - t1))
    t2_th = int(num_class * (1 - t2))
    if min(t1_th, t2_th) < 1 or max(t1_th, t2_th) > S:
        raise ValueError(
            f"kthvalue rank out of range for sampled set: t1_th={t1_th}, "
            f"t2_th={t2_th}, S={S}")
    k_top = S - t2_th + 1                              # covers both ranks
    top_vals = lax.top_k(prod, k_top)[0]               # (N, k_top), descending
    t1_ip = jnp.maximum(jnp.mean(top_vals[:, S - t1_th]), 0.0)
    t2_ip = jnp.mean(top_vals[:, S - t2_th])

    positive_mask = prod > t1_ip
    negative_mask = prod < t2_ip

    # ---- fixed-size positive/negative pair balancing (2 argsorts total) ----
    NS = N * S
    cos_flat = cos.reshape(NS)
    pmask = positive_mask.reshape(NS)
    nmask = negative_mask.reshape(NS)
    num_positive = jnp.sum(pmask)
    num_negative = jnp.sum(nmask)

    kp, kn = jax.random.split(perm_key)

    def rand_select(mask, key):
        # Masked entries get random keys in [0,1), unmasked get 2.0 -> the
        # first count(mask) entries of the permutation are the masked cosines
        # in random order (torch.randperm analogue).
        keys = jnp.where(mask, jax.random.uniform(key, (NS,)), 2.0)
        return cos_flat[jnp.argsort(keys)]

    sim_p = rand_select(pmask, kp)
    sim_n = rand_select(nmask, kn)

    # Torch subsamples the larger set with randperm and pairs index-wise with
    # the smaller set; pairing is arbitrary, so a random order on both sides
    # is statistically equivalent (the smaller set contributes all its
    # entries either way).
    m = jnp.minimum(num_positive, num_negative)
    hinge = jnp.maximum(sim_n - sim_p + alpha, 0.0)
    valid = jnp.arange(NS) < m
    triplet_loss = (jnp.sum(jnp.where(valid, hinge, 0.0))
                    / jnp.maximum(m, 1).astype(f32))

    # TODO(synk): lsh.query_remove(...) / last_removed update mutate the
    # host-side LSH hash table; pure data-structure bookkeeping, no kernel.
    return logits, sample_ids, triplet_loss


if __name__ == "__main__":
    # Small shapes consistent with the module's forward.
    N, D, num_class, K, L = 8, 32, 64, 4, 2

    key = jax.random.PRNGKey(0)
    k_x, k_w, k_rp, k_perm = jax.random.split(key, 4)

    x = jax.random.normal(k_x, (N, D), jnp.float32)

    # init_weights(): weight ~ U(-0.05, 0.05), bias (num_class, 1) filled with 0.
    initrange = 0.05
    weight = jax.random.uniform(k_w, (num_class, D), jnp.float32,
                                -initrange, initrange)
    bias = jnp.zeros((num_class, 1), jnp.float32)
    rp = jax.random.normal(k_rp, (D + 1, K * L), jnp.float32)   # SimHash rp

    # TODO(synk): id set returned by lsh.query_multi; here every class is
    # retrieved (also required for kthvalue with k ~ num_class to be valid).
    sample_ids = jnp.arange(num_class, dtype=jnp.int32)

    logits, sids, loss = lsh_sampled_forward(
        x, weight, bias, rp, sample_ids, k_perm, num_class=num_class)
    jax.block_until_ready((logits, sids, loss))
    print("KERNEL_OK")
</pallas_src>

<mosaic_0001>
module attributes {stable_mosaic.version = 11 : i64} {
  func.func @_fused_kernel(%arg0: i32, %arg1: i32, %arg2: memref<16x32xbf16, #tpu.memory_space<vmem>>, %arg3: memref<32x128xbf16, #tpu.memory_space<vmem>>, %arg4: memref<1x128xf32, #tpu.memory_space<vmem>>, %arg5: memref<16x128xbf16, #tpu.memory_space<vmem>>, %arg6: memref<128x128xbf16, #tpu.memory_space<vmem>>, %arg7: memref<16x128xf32, #tpu.memory_space<vmem>>, %arg8: memref<16x128xbf16, #tpu.memory_space<vmem>>) attributes {dimension_semantics = [#tpu.dimension_semantics<parallel>, #tpu.dimension_semantics<parallel>], iteration_bounds = array<i64: 1, 1>, scalar_prefetch = 0 : i64, scratch_operands = 0 : i64, tpu.core_type = #tpu.core_type<tc>, window_params = [{transform_indices = @transform_0, window_bounds = array<i64: 16, 32>}, {transform_indices = @transform_1, window_bounds = array<i64: 32, 128>}, {transform_indices = @transform_2, window_bounds = array<i64: 1, 128>}, {transform_indices = @transform_3, window_bounds = array<i64: 16, 128>}, {transform_indices = @transform_4, window_bounds = array<i64: 128, 128>}, {transform_indices = @transform_5, window_bounds = array<i64: 16, 128>}, {transform_indices = @transform_6, window_bounds = array<i64: 16, 128>}]} {
    %c0 = arith.constant 0 : index
    %c0_0 = arith.constant 0 : index
    %0 = vector.load %arg2[%c0, %c0_0] : memref<16x32xbf16, #tpu.memory_space<vmem>>, vector<16x32xbf16>
    %c0_1 = arith.constant 0 : index
    %c0_2 = arith.constant 0 : index
    %1 = vector.load %arg3[%c0_1, %c0_2] : memref<32x128xbf16, #tpu.memory_space<vmem>>, vector<32x128xbf16>
    %cst = arith.constant dense<0.000000e+00> : vector<16x128xf32>
    %2 = tpu.matmul %0, %1, %cst {dimension_numbers = #tpu.dot_dimension_numbers<[1], [0], [0], [1], [0, 0, 1, 1], [], []>} : vector<16x32xbf16>, vector<32x128xbf16>, vector<16x128xf32> -> vector<16x128xf32>
    %c0_3 = arith.constant 0 : index
    %c0_4 = arith.constant 0 : index
    %3 = vector.load %arg4[%c0_3, %c0_4] : memref<1x128xf32, #tpu.memory_space<vmem>>, vector<1x128xf32>
    %4 = vector.broadcast %3 : vector<1x128xf32> to vector<16x128xf32>
    %5 = arith.addf %2, %4 : vector<16x128xf32>
    %c0_5 = arith.constant 0 : index
    %c0_6 = arith.constant 0 : index
    %6 = vector.load %arg7[%c0_5, %c0_6] : memref<16x128xf32, #tpu.memory_space<vmem>>, vector<16x128xf32>
    tpu.vector_store %arg7[%c0_5, %c0_6], %5 {strides = array<i32>} : memref<16x128xf32, #tpu.memory_space<vmem>>, vector<16x128xf32>,
    %c0_7 = arith.constant 0 : index
    %c0_8 = arith.constant 0 : index
    %7 = vector.load %arg5[%c0_7, %c0_8] : memref<16x128xbf16, #tpu.memory_space<vmem>>, vector<16x128xbf16>
    %c0_9 = arith.constant 0 : index
    %c0_10 = arith.constant 0 : index
    %8 = vector.load %arg6[%c0_9, %c0_10] : memref<128x128xbf16, #tpu.memory_space<vmem>>, vector<128x128xbf16>
    %cst_11 = arith.constant dense<0.000000e+00> : vector<16x128xf32>
    %9 = tpu.matmul %7, %8, %cst_11 {dimension_numbers = #tpu.dot_dimension_numbers<[1], [0], [0], [1], [0, 0, 1, 1], [], []>} : vector<16x128xbf16>, vector<128x128xbf16>, vector<16x128xf32> -> vector<16x128xf32>
    %10 = arith.truncf %9 : vector<16x128xf32> to vector<16x128xbf16>
    %c0_12 = arith.constant 0 : index
    %c0_13 = arith.constant 0 : index
    %11 = vector.load %arg8[%c0_12, %c0_13] : memref<16x128xbf16, #tpu.memory_space<vmem>>, vector<16x128xbf16>
    tpu.vector_store %arg8[%c0_12, %c0_13], %10 {strides = array<i32>} : memref<16x128xbf16, #tpu.memory_space<vmem>>, vector<16x128xbf16>,
    return
  }
  func.func @transform_0(%arg0: i32, %arg1: i32) -> (i32, i32) {
    %c0_i32 = arith.constant 0 : i32
    %c0_i32_0 = arith.constant 0 : i32
    return %arg0, %c0_i32 : i32, i32
  }
  func.func @transform_1(%arg0: i32, %arg1: i32) -> (i32, i32) {
    %c0_i32 = arith.constant 0 : i32
    %c0_i32_0 = arith.constant 0 : i32
    return %c0_i32, %arg1 : i32, i32
  }
  func.func @transform_2(%arg0: i32, %arg1: i32) -> (i32, i32) {
    %c0_i32 = arith.constant 0 : i32
    %c0_i32_0 = arith.constant 0 : i32
    return %c0_i32, %arg1 : i32, i32
  }
  func.func @transform_3(%arg0: i32, %arg1: i32) -> (i32, i32) {
    %c0_i32 = arith.constant 0 : i32
    %c0_i32_0 = arith.constant 0 : i32
    return %arg0, %c0_i32 : i32, i32
  }
  func.func @transform_4(%arg0: i32, %arg1: i32) -> (i32, i32) {
    %c0_i32 = arith.constant 0 : i32
    %c0_i32_0 = arith.constant 0 : i32
    return %c0_i32, %arg1 : i32, i32
  }
  func.func @transform_5(%arg0: i32, %arg1: i32) -> (i32, i32) {
    %c0_i32 = arith.constant 0 : i32
    return %arg0, %arg1 : i32, i32
  }
  func.func @transform_6(%arg0: i32, %arg1: i32) -> (i32, i32) {
    %c0_i32 = arith.constant 0 : i32
    return %arg0, %arg1 : i32, i32
  }
}

</mosaic_0001>

<bundles_post_ra>
// kernel: lsh_sampled_forward.3
= control target key start
LH: loop header
LB: loop body
LE: loop exit
PB: predicated region body
PF: predicated region fallthrough
CT: control target
= control target key end

     0   :  { %vm50_vm0 = vcmask 261120   ;;  %s318_s4 = inlined_call_operand.vmem [shape: bf16[128,128], index: 4, kind: input, shape index: {}]   ;;  %s319_s1 = inlined_call_operand.vmem [shape: bf16[32,128], index: 1, kind: input, shape index: {}]   ;;  %s320_s0 = inlined_call_operand.vmem [shape: bf16[16,32], index: 0, kind: input, shape index: {}]   ;;  %s321_s2 = inlined_call_operand.vmem [shape: f32[1,128], index: 2, kind: input, shape index: {}]   ;;  %s322_s3 = inlined_call_operand.vmem [shape: bf16[16,128], index: 3, kind: input, shape index: {}]   ;;  %s323_s5 = inlined_call_operand.vmem [shape: f32[16,128], index: 5, kind: output, shape index: {0}]   ;;  %s324_s6 = inlined_call_operand.vmem [shape: bf16[16,128], index: 6, kind: output, shape index: {1}]  }
   0x1   :  { %v228_v0 = vld [vmem:[%s318_s4 + $0x38] sm:$0xff]  ;;  %v219_v1 = vld [vmem:[%s319_s1 + $0x8] sm:$0xff]  ;;  %v227_v2 = vld [vmem:[%s318_s4 + $0x30] sm:$0xff] }
   0x2   :  { %142 = vmatpush.bf16.msra.mxu1 %v228_v0  ;;  %60 = vmatpush.bf16.msra.mxu0 %v219_v1  ;;  %v218_v3 = vld [vmem:[%s319_s1] sm:$0xff]  ;;  %v226_v4 = vld [vmem:[%s318_s4 + $0x28] sm:$0xff]  ;;  %v224_v7 = vld [vmem:[%s318_s4 + $0x18] sm:$0xff] }
   0x3   :  { %v217_v5 = vld [vmem:[%s320_s0] sm:$0xff]  ;;  %v223_v8 = vld [vmem:[%s318_s4 + $0x10] sm:$0xff]  ;;  %v222_v9 = vld [vmem:[%s318_s4 + $0x8] sm:$0xff] }
   0x4   :  { %v225_v6 = vld [vmem:[%s318_s4 + $0x20] sm:$0xff] }
   0x5   :  { %v221_v10 = vld [vmem:[%s318_s4] sm:$0xff] }
   0x6   :  { %143 = vmatpush.bf16.msra.mxu1 %v227_v2  ;;  %61 = vmatpush.bf16.msra.mxu0 %v218_v3  ;;  %v220_v11 = vld [vmem:[%s322_s3] sm:$0xff] }
   0x7   :  { %v234_v12 = vld [vmem:[%s321_s2] ss:$0 sm:$0xff] }
   0x9   :  { %180 = vmatmul.msk.bf16.vlgmr.msra.gmra.mxu0 %vm50_vm0, %v217_v5 }
   0xa   :  { %144 = vmatpush.bf16.msra.mxu1 %v226_v4 }
   0xe   :  { %145 = vmatpush.bf16.msra.mxu1 %v225_v6 }
  0x12   :  { %146 = vmatpush.bf16.msra.mxu1 %v224_v7 }
  0x16   :  { %147 = vmatpush.bf16.msra.mxu1 %v223_v8 }
  0x1a   :  { %148 = vmatpush.bf16.msra.mxu1 %v222_v9 }
  0x1e   :  { %149 = vmatpush.bf16.msra.mxu1 %v221_v10 }
  0x21   :  { %150 = vmatmul.bf16.vlgmr.msra.gmra.mxu1 %v220_v11 }
  0x86   :  { %v63_v13 = vpop.f32.mrf.mxu0 }
  0x87   :  { %v64_v14 = vadd.f32 %v234_v12, %v63_v13 }
  0x89   :  { %68 = vst [vmem:[%s323_s5] sm:$0xff] %v64_v14 }
  0x8e   :  { %v65_v15 = vpop.f32.mrf.mxu0 }
  0x8f   :  { %v66_v16 = vadd.f32 %v234_v12, %v65_v15 }
  0x91   :  { %69 = vst [vmem:[%s323_s5 + $0x8] sm:$0xff] %v66_v16 }
  0x9e   :  { %v151_v17 = vpop.f32.mrf.mxu1 }
  0xa6   :  { %v153_v18 = vpop.f32.mrf.mxu1 }
  0xa7   :  { %v232_v19 = vpack.c.bf16 %v153_v18, %v151_v17 }
  0xa9   :  { %233 = vst [vmem:[%s324_s6] sm:$0xff] %v232_v19  }

</bundles_post_ra>
